<compile_context>
chip_gen: v5e
topology: v5e:2x2
jax: 0.10.0
libtpu: 0.0.40
codegen_flags: <defaults>
</compile_context>

<pallas_src>
import math
import jax
import jax.numpy as jnp
from jax.experimental import pallas as pl
from jax.experimental.pallas import tpu as pltpu

_LANE = 128       # TPU lane width; batch tiles are multiples of this.
_TB_MAX = 2048    # larger tiles start streaming (32, tb) f32 intermediates via VMEM
_FMA_K_MAX = 4    # layers with contraction dim <= this use VPU broadcast-FMAs


def _mlp_kernel(x_ref, *refs):
    """Fused MLP: tanh on every layer except the last.

    x_ref: (d_in, tb)  -- batch on the lane axis
    refs = (w0, b0, w1, b1, ..., w_{L-1}, b_{L-1}, out_ref)
      w_l: (d_out_l, d_in_l)   (torch nn.Linear layout)
      b_l: (d_out_l, 1)        (broadcasts over the batch/lane axis)
    """
    out_ref = refs[-1]
    wb_refs = refs[:-1]
    n_layers = len(wb_refs) // 2

    h = x_ref[...].astype(jnp.float32)              # (d_in, tb)
    for l in range(n_layers):                       # static Python loop
        w = wb_refs[2 * l][...]                     # (d_out_l, d_in_l)
        b = wb_refs[2 * l + 1][...]                 # (d_out_l, 1)
        d_in_l = w.shape[1]
        if l == 0 and d_in_l <= _FMA_K_MAX:
            # Tiny contraction: outer-product FMAs on the VPU instead of a
            # K=d_in_l MXU matmul (keeps the MXU off the warm-up path).
            acc = w[:, 0:1] * h[0:1, :] + b         # (d_out_l, tb)
            for k in range(1, d_in_l):
                acc = acc + w[:, k:k + 1] * h[k:k + 1, :]
            h = acc
        else:
            h = jnp.dot(w, h, preferred_element_type=jnp.float32) + b
        if l < n_layers - 1:
            h = jnp.tanh(h)
    out_ref[...] = h.astype(out_ref.dtype)


def _num_tensorcores_per_chip():
    """v7x has 2 TensorCores per chip; v5e/v6e have 1."""
    try:
        kind = jax.devices()[0].device_kind.lower()
    except Exception:
        return 1
    return 2 if "v7" in kind else 1


def _round_up(n, m):
    return ((n + m - 1) // m) * m


def _pick_tile(B, tb=None):
    """Choose a lane-multiple batch tile given the chip's TensorCore count."""
    num_tc = _num_tensorcores_per_chip()
    Bp = _round_up(max(B, _LANE), _LANE)
    if tb is None:
        if num_tc >= 2 and Bp > _LANE:
            # >= 2 parallel tiles so both TensorCores (v7x) get work.
            tb = _round_up(pl.cdiv(Bp, num_tc), _LANE)
        else:
            # Single TC (v5e/v6e): one big tile -> grid=(1,), no step overhead.
            tb = Bp
        tb = min(tb, _TB_MAX)
    tb = max(_LANE, _round_up(min(tb, Bp), _LANE))
    n_tiles = pl.cdiv(Bp, tb)
    return tb, n_tiles, n_tiles * tb


def _run_kernel(xt, params, tb, n_tiles, Bp):
    """xt: (d_in, Bp) with Bp = n_tiles * tb.  Returns (d_out, Bp)."""
    d_in, _ = xt.shape
    d_out = params[-1][0].shape[0]

    in_specs = [pl.BlockSpec((d_in, tb), lambda i: (0, i))]
    flat_params = []
    hidden_dims = []
    flops = 0
    weight_bytes = 0
    for l, (w, b) in enumerate(params):
        b2 = b.reshape(-1, 1)                       # (d_out_l, 1)
        flat_params.append(w)
        flat_params.append(b2)
        # Weights/biases are tiny: every grid step sees the full array
        # (block (0,0)), so they are DMA'd once and stay VMEM-resident.
        in_specs.append(pl.BlockSpec(w.shape, lambda i: (0, 0)))
        in_specs.append(pl.BlockSpec(b2.shape, lambda i: (0, 0)))
        flops += 2 * Bp * w.shape[0] * w.shape[1]
        weight_bytes += w.size * w.dtype.itemsize + b2.size * b2.dtype.itemsize
        if l < len(params) - 1:
            hidden_dims.append(w.shape[0])

    cost = pl.CostEstimate(
        flops=flops,
        transcendentals=Bp * sum(hidden_dims),
        bytes_accessed=Bp * (d_in + d_out) * 4 + weight_bytes,
    )

    return pl.pallas_call(
        _mlp_kernel,
        out_shape=jax.ShapeDtypeStruct((d_out, Bp), xt.dtype),
        grid=(n_tiles,),
        in_specs=in_specs,
        out_specs=pl.BlockSpec((d_out, tb), lambda i: (0, i)),
        compiler_params=pltpu.CompilerParams(
            dimension_semantics=("parallel",)),
        cost_estimate=cost,
    )(xt, *flat_params)


def schrodinger_pinn_forward(x, params, *, tb=None, features_first=False):
    """SchrodingerPINN.forward as a fused Pallas kernel.

    x: (B, layers[0]) float32, or (layers[0], B) if features_first=True
       (the latter avoids all wrapper-side transpose/pad/slice ops when B is a
       multiple of the chosen tile -- preferred inside a training step).
    params: list of (W, b) with W: (d_out, d_in) (torch layout), b: (d_out,)
    returns (B, layers[-1]) float32, or (layers[-1], B) if features_first.
    """
    if features_first:
        _, B = x.shape
        xt = x
    else:
        B, _ = x.shape
        xt = x.T

    tb, n_tiles, Bp = _pick_tile(B, tb)
    if Bp != B:
        # Zero-padded lanes are independent of valid lanes and sliced off below.
        xt = jnp.pad(xt, ((0, 0), (0, Bp - B)))

    out_t = _run_kernel(xt, params, tb, n_tiles, Bp)

    if Bp != B:
        out_t = out_t[:, :B]
    return out_t if features_first else out_t.T


def init_params(layers, key):
    """Init matching torch.nn.Linear default (U(-k, k), k=1/sqrt(fan_in))."""
    params = []
    for i in range(len(layers) - 1):
        fan_in, fan_out = layers[i], layers[i + 1]
        key, kw, kb = jax.random.split(key, 3)
        bound = 1.0 / math.sqrt(fan_in)
        w = jax.random.uniform(kw, (fan_out, fan_in), jnp.float32, -bound, bound)
        b = jax.random.uniform(kb, (fan_out,), jnp.float32, -bound, bound)
        params.append((w, b))
    return params


def reference_forward(x, params):
    """Pure-JAX reference of SchrodingerPINN.forward (torch layout weights)."""
    h = x
    for l, (w, b) in enumerate(params):
        h = h @ w.T + b
        if l < len(params) - 1:
            h = jnp.tanh(h)
    return h


# TODO(synk): compute_pde_residual / loss_function rely on torch.autograd
# higher-order derivatives and complex arithmetic; only forward() is kernelized.

if __name__ == "__main__":
    # Module config: layers = [2, 32, 32, 1]  (inputs are (x, t) pairs); m unused in forward.
    layers = [2, 32, 32, 1]
    m = 1.0  # unused in forward

    key = jax.random.PRNGKey(0)
    key, kx = jax.random.split(key)
    params = init_params(layers, key)

    # A modest collocation batch.  Tile size / grid are picked automatically:
    # grid=(1,) on single-TC v5e/v6e, >=2 parallel tiles on dual-TC v7x.
    batch = 512
    x = jax.random.normal(kx, (batch, layers[0]), jnp.float32)
    ref = reference_forward(x, params)

    # Standard (batch, features) entry point.
    out = schrodinger_pinn_forward(x, params)
    out = jax.block_until_ready(out)
    assert out.shape == (batch, layers[-1])
    assert jnp.allclose(out, ref, atol=1e-5, rtol=1e-5), "kernel mismatch vs reference"

    # Features-first entry point (no wrapper transpose/pad round trips).
    out_t = schrodinger_pinn_forward(x.T, params, features_first=True)
    out_t = jax.block_until_ready(out_t)
    assert out_t.shape == (layers[-1], batch)
    assert jnp.allclose(out_t.T, ref, atol=1e-5, rtol=1e-5), "features-first mismatch"

    print("KERNEL_OK")
</pallas_src>

<mosaic_0001>
module attributes {stable_mosaic.version = 11 : i64} {
  func.func @_mlp_kernel(%arg0: i32, %arg1: memref<2x512xf32, #tpu.memory_space<vmem>>, %arg2: memref<32x2xf32, #tpu.memory_space<vmem>>, %arg3: memref<32x1xf32, #tpu.memory_space<vmem>>, %arg4: memref<32x32xf32, #tpu.memory_space<vmem>>, %arg5: memref<32x1xf32, #tpu.memory_space<vmem>>, %arg6: memref<1x32xf32, #tpu.memory_space<vmem>>, %arg7: memref<1x1xf32, #tpu.memory_space<vmem>>, %arg8: memref<1x512xf32, #tpu.memory_space<vmem>>) attributes {dimension_semantics = [#tpu.dimension_semantics<parallel>], iteration_bounds = array<i64: 1>, scalar_prefetch = 0 : i64, scratch_operands = 0 : i64, tpu.core_type = #tpu.core_type<tc>, window_params = [{transform_indices = @transform_0, window_bounds = array<i64: 2, 512>}, {pipeline_mode = #tpu.pipeline_mode<synchronous>, transform_indices = @transform_1, window_bounds = array<i64: 32, 2>}, {pipeline_mode = #tpu.pipeline_mode<synchronous>, transform_indices = @transform_2, window_bounds = array<i64: 32, 1>}, {pipeline_mode = #tpu.pipeline_mode<synchronous>, transform_indices = @transform_3, window_bounds = array<i64: 32, 32>}, {pipeline_mode = #tpu.pipeline_mode<synchronous>, transform_indices = @transform_4, window_bounds = array<i64: 32, 1>}, {pipeline_mode = #tpu.pipeline_mode<synchronous>, transform_indices = @transform_5, window_bounds = array<i64: 1, 32>}, {pipeline_mode = #tpu.pipeline_mode<synchronous>, transform_indices = @transform_6, window_bounds = array<i64: 1, 1>}, {transform_indices = @transform_7, window_bounds = array<i64: 1, 512>}]} {
    %c0 = arith.constant 0 : index
    %c0_0 = arith.constant 0 : index
    %0 = vector.load %arg1[%c0, %c0_0] : memref<2x512xf32, #tpu.memory_space<vmem>>, vector<2x512xf32>
    %c0_1 = arith.constant 0 : index
    %c0_2 = arith.constant 0 : index
    %1 = vector.load %arg2[%c0_1, %c0_2] : memref<32x2xf32, #tpu.memory_space<vmem>>, vector<32x2xf32>
    %c0_3 = arith.constant 0 : index
    %c0_4 = arith.constant 0 : index
    %2 = vector.load %arg3[%c0_3, %c0_4] : memref<32x1xf32, #tpu.memory_space<vmem>>, vector<32x1xf32>
    %3 = vector.extract_strided_slice %1 {offsets = [0, 0], sizes = [32, 1], strides = [1, 1]} : vector<32x2xf32> to vector<32x1xf32>
    %4 = vector.extract_strided_slice %0 {offsets = [0, 0], sizes = [1, 512], strides = [1, 1]} : vector<2x512xf32> to vector<1x512xf32>
    %5 = vector.broadcast %3 : vector<32x1xf32> to vector<32x512xf32>
    %6 = vector.broadcast %4 : vector<1x512xf32> to vector<32x512xf32>
    %7 = arith.mulf %5, %6 : vector<32x512xf32>
    %8 = vector.broadcast %2 : vector<32x1xf32> to vector<32x512xf32>
    %9 = arith.addf %7, %8 : vector<32x512xf32>
    %10 = vector.extract_strided_slice %1 {offsets = [0, 1], sizes = [32, 1], strides = [1, 1]} : vector<32x2xf32> to vector<32x1xf32>
    %11 = vector.extract_strided_slice %0 {offsets = [1, 0], sizes = [1, 512], strides = [1, 1]} : vector<2x512xf32> to vector<1x512xf32>
    %12 = vector.broadcast %10 : vector<32x1xf32> to vector<32x512xf32>
    %13 = vector.broadcast %11 : vector<1x512xf32> to vector<32x512xf32>
    %14 = arith.mulf %12, %13 : vector<32x512xf32>
    %15 = arith.addf %9, %14 : vector<32x512xf32>
    %16 = math.tanh %15 : vector<32x512xf32>
    %c0_5 = arith.constant 0 : index
    %c0_6 = arith.constant 0 : index
    %17 = vector.load %arg4[%c0_5, %c0_6] : memref<32x32xf32, #tpu.memory_space<vmem>>, vector<32x32xf32>
    %c0_7 = arith.constant 0 : index
    %c0_8 = arith.constant 0 : index
    %18 = vector.load %arg5[%c0_7, %c0_8] : memref<32x1xf32, #tpu.memory_space<vmem>>, vector<32x1xf32>
    %cst = arith.constant dense<0.000000e+00> : vector<32x512xf32>
    %19 = tpu.matmul %17, %16, %cst {dimension_numbers = #tpu.dot_dimension_numbers<[1], [0], [0], [1], [0, 0, 1, 1], [], []>} : vector<32x32xf32>, vector<32x512xf32>, vector<32x512xf32> -> vector<32x512xf32>
    %20 = vector.broadcast %18 : vector<32x1xf32> to vector<32x512xf32>
    %21 = arith.addf %19, %20 : vector<32x512xf32>
    %22 = math.tanh %21 : vector<32x512xf32>
    %c0_9 = arith.constant 0 : index
    %c0_10 = arith.constant 0 : index
    %23 = vector.load %arg6[%c0_9, %c0_10] : memref<1x32xf32, #tpu.memory_space<vmem>>, vector<1x32xf32>
    %c0_11 = arith.constant 0 : index
    %c0_12 = arith.constant 0 : index
    %24 = vector.load %arg7[%c0_11, %c0_12] : memref<1x1xf32, #tpu.memory_space<vmem>>, vector<1x1xf32>
    %cst_13 = arith.constant dense<0.000000e+00> : vector<1x512xf32>
    %25 = tpu.matmul %23, %22, %cst_13 {dimension_numbers = #tpu.dot_dimension_numbers<[1], [0], [0], [1], [0, 0, 1, 1], [], []>} : vector<1x32xf32>, vector<32x512xf32>, vector<1x512xf32> -> vector<1x512xf32>
    %26 = vector.broadcast %24 : vector<1x1xf32> to vector<1x512xf32>
    %27 = arith.addf %25, %26 : vector<1x512xf32>
    %c0_14 = arith.constant 0 : index
    %c0_15 = arith.constant 0 : index
    %28 = vector.load %arg8[%c0_14, %c0_15] : memref<1x512xf32, #tpu.memory_space<vmem>>, vector<1x512xf32>
    tpu.vector_store %arg8[%c0_14, %c0_15], %27 {strides = array<i32>} : memref<1x512xf32, #tpu.memory_space<vmem>>, vector<1x512xf32>,
    return
  }
  func.func @transform_0(%arg0: i32) -> (i32, i32) {
    %c0_i32 = arith.constant 0 : i32
    %c0_i32_0 = arith.constant 0 : i32
    return %c0_i32, %arg0 : i32, i32
  }
  func.func @transform_1(%arg0: i32) -> (i32, i32) {
    %c0_i32 = arith.constant 0 : i32
    %c0_i32_0 = arith.constant 0 : i32
    %c0_i32_1 = arith.constant 0 : i32
    return %c0_i32, %c0_i32_0 : i32, i32
  }
  func.func @transform_2(%arg0: i32) -> (i32, i32) {
    %c0_i32 = arith.constant 0 : i32
    %c0_i32_0 = arith.constant 0 : i32
    %c0_i32_1 = arith.constant 0 : i32
    return %c0_i32, %c0_i32_0 : i32, i32
  }
  func.func @transform_3(%arg0: i32) -> (i32, i32) {
    %c0_i32 = arith.constant 0 : i32
    %c0_i32_0 = arith.constant 0 : i32
    %c0_i32_1 = arith.constant 0 : i32
    return %c0_i32, %c0_i32_0 : i32, i32
  }
  func.func @transform_4(%arg0: i32) -> (i32, i32) {
    %c0_i32 = arith.constant 0 : i32
    %c0_i32_0 = arith.constant 0 : i32
    %c0_i32_1 = arith.constant 0 : i32
    return %c0_i32, %c0_i32_0 : i32, i32
  }
  func.func @transform_5(%arg0: i32) -> (i32, i32) {
    %c0_i32 = arith.constant 0 : i32
    %c0_i32_0 = arith.constant 0 : i32
    %c0_i32_1 = arith.constant 0 : i32
    return %c0_i32, %c0_i32_0 : i32, i32
  }
  func.func @transform_6(%arg0: i32) -> (i32, i32) {
    %c0_i32 = arith.constant 0 : i32
    %c0_i32_0 = arith.constant 0 : i32
    %c0_i32_1 = arith.constant 0 : i32
    return %c0_i32, %c0_i32_0 : i32, i32
  }
  func.func @transform_7(%arg0: i32) -> (i32, i32) {
    %c0_i32 = arith.constant 0 : i32
    %c0_i32_0 = arith.constant 0 : i32
    return %c0_i32, %arg0 : i32, i32
  }
}

</mosaic_0001>

<bundles_post_ra>
// kernel: tpu_custom_call.1
= control target key start
LH: loop header
LB: loop body
LE: loop exit
PB: predicated region body
PF: predicated region fallthrough
CT: control target
= control target key end

     0   :  { %s797_s0 = inlined_call_operand.vmem [shape: f32[2,512], index: 0, kind: input, shape index: {}]   ;;  %s798_s1 = inlined_call_operand.vmem [shape: f32[32,2], index: 1, kind: input, shape index: {}]   ;;  %s799_s2 = inlined_call_operand.vmem [shape: f32[32,1], index: 2, kind: input, shape index: {}]   ;;  %s800_s3 = inlined_call_operand.vmem [shape: f32[32,32], index: 3, kind: input, shape index: {}]   ;;  %s801_s4 = inlined_call_operand.vmem [shape: f32[32,1], index: 4, kind: input, shape index: {}]   ;;  %s802_s5 = inlined_call_operand.vmem [shape: f32[1,32], index: 5, kind: input, shape index: {}]   ;;  %s803_s6 = inlined_call_operand.<no memory space> [shape: f32[1,1], index: 6, kind: input, shape index: {}]   ;;  %s804_s7 = inlined_call_operand.hbm [shape: f32[1,512], index: 7, kind: output, shape index: {}]  }
   0x1   :  { %v12_v0 = vstv %s803_s6 }
   0x2   :  { %13 = vst [vmem:[#allocation2] sm:$0x1] %v12_v0 }
   0x3   :  { %v37_v1 = vld [vmem:[%s799_s2 + $0x18] sm:$0xff]  ;;  %v31_v3 = vld [vmem:[%s798_s1 + $0x8] sm:$0xff]  ;;  %v620_v4 = vmov 0  }
   0x4   :  { %v33_v2 = vld [vmem:[%s798_s1 + $0x18] sm:$0xff]  ;;  %524 = vset.pattern.permute.xlu2 %v620_v4  ;;  %522 = vset.pattern.permute.xlu1 %v620_v4 }
   0x5   :  { %521 = vset.pattern.permute.xlu0 %v620_v4  ;;  %104 = vperm.xlu1 %522, %v37_v1  }
   0x6   :  { %55 = vperm.xlu0 %521, %v33_v2   ;;  %45 = vperm.xlu2 %524, %v31_v3  }
   0x7   :  { %14 = vsyncpa [#allocation4], 0  ;;  %v32_v5 = vld [vmem:[%s798_s1 + $0x10] sm:$0xff]  ;;  %v621_v7 = vmov 1   ;;  %v35_v8 = vld [vmem:[%s799_s2 + $0x8] sm:$0xff]  ;;  %vm227_vm0 = vcmask 261120  }
   0x8   :  { %v36_v6 = vld [vmem:[%s799_s2 + $0x10] sm:$0xff]  ;;  %v30_v9 = vld [vmem:[%s798_s1] sm:$0xff]  ;;  %vm470_vm1 = vcmask 1040384   ;;  %vm472_vm2 = vcmask 1042434   ;;  %s489_s12 = sshll.u32 %s804_s7, 4  ;;  %vm474_vm3 = vcmask 1041408   ;;  %s490_s12 = int_to_ptr.hbm [resolvable:$true] %s489_s12 }
   0x9   :  { %v34_v10 = vld [vmem:[%s799_s2] sm:$0xff]  ;;  %v205_v11 = vld [vmem:[%s801_s4 + $0x10] sm:$0xff] }
   0xa   :  { %v373_v12 = vld [vmem:[#allocation2] sm:$0x1] }
   0xb   :  { %v29_v13 = vld [vmem:[%s797_s0] sm:$0xff] }
   0xc   :  { %v59_v15 = vperm.slane %v29_v13, 0  ;;  %v60_v16 = vperm.slane %v29_v13, 2  ;;  %v61_v17 = vperm.slane %v29_v13, 4  ;;  %v62_v18 = vperm.slane %v29_v13, 6 }
   0xd   :  { %523 = vset.pattern.permute.xlu1 %v621_v7  ;;  %v139_v24 = vperm.slane %v29_v13, 1  ;;  %v140_v25 = vperm.slane %v29_v13, 3  ;;  %v141_v26 = vperm.slane %v29_v13, 5  ;;  %v142_v27 = vperm.slane %v29_v13, 7  ;;  %v206_v13 = vld [vmem:[%s801_s4 + $0x18] sm:$0xff] }
   0xe   :  { %50 = vperm.xlu0 %521, %v32_v5   ;;  %99 = vperm.xlu2 %524, %v36_v6   ;;  %v698_v21 = vperm.slane %v59_v15, 0  ;;  %v700_v22 = vperm.slane %v60_v16, 0  ;;  %v702_v23 = vperm.slane %v61_v17, 0  ;;  %v704_v28 = vperm.slane %v62_v18, 0 }
   0xf   :  { %136 = vperm.xlu1 %523, %v33_v2   ;;  %v709_v33 = vperm.slane %v139_v24, 1  ;;  %v711_v34 = vperm.slane %v140_v25, 1  ;;  %v713_v35 = vperm.slane %v141_v26, 1  ;;  %v715_v36 = vperm.slane %v142_v27, 1 }
  0x16   :  { %525 = vset.pattern.permute.xlu0 %v621_v7  ;;  %94 = vperm.xlu2 %524, %v35_v8  }
  0x17   :  { %526 = vset.pattern.permute.xlu1 %v620_v4  ;;  %132 = vperm.xlu0 %525, %v32_v5  }
  0x18   :  { %40 = vperm.xlu1 %526, %v30_v9  }
  0x1e   :  { %89 = vperm.xlu2 %524, %v34_v10  }
  0x1f   :  { %124 = vperm.xlu0 %525, %v30_v9  }
  0x20   :  { %527 = vset.pattern.permute.xlu1 %v621_v7 }
  0x21   :  { %128 = vperm.xlu1 %527, %v31_v3  }
  0x26   :  { %219 = vperm.xlu2 %524, %v205_v11  }
  0x27   :  { %529 = vset.pattern.permute.xlu0 %v620_v4 }
  0x29   :  { %528 = vset.pattern.permute.xlu1 %v620_v4 }
  0x2a   :  { %224 = vperm.xlu1 %528, %v206_v13  }
  0x2e   :  { %376 = vperm.xlu2 %524, %v373_v12  }
  0x60   :  { %v696_v14 = vpop.permute.xlu2 %45 }
  0x61   :  { %v75_v10 = vmul.f32 %v698_v21, %v696_v14  ;;  %v76_v11 = vmul.f32 %v700_v22, %v696_v14  ;;  %v77_v12 = vmul.f32 %v702_v23, %v696_v14  ;;  %v78_v17 = vmul.f32 %v704_v28, %v696_v14 }
  0x68   :  { %v100_v32 = vpop.permute.xlu2 %99 }
  0x70   :  { %v95_v56 = vpop.permute.xlu2 %94 }
  0x71   :  { %v112_v24 = vadd.f32 %v95_v56, %v76_v11  ;;  %v113_v25 = vadd.f32 %v95_v56, %v77_v12 }
  0x77   :  { %v105_v19 = vpop.permute.xlu1 %104 }
  0x78   :  { %v56_v20 = vpop.permute.xlu0 %55  ;;  %v90_v26 = vpop.permute.xlu2 %89 }
  0x79   :  { %v83_v29 = vmul.f32 %v698_v21, %v56_v20  ;;  %v84_v30 = vmul.f32 %v700_v22, %v56_v20  ;;  %v85_v31 = vmul.f32 %v702_v23, %v56_v20  ;;  %v86_v37 = vmul.f32 %v704_v28, %v56_v20 }
  0x7a   :  { %v111_v20 = vadd.f32 %v95_v56, %v75_v10 }
  0x7b   :  { %v119_v40 = vadd.f32 %v105_v19, %v83_v29  ;;  %v120_v41 = vadd.f32 %v105_v19, %v84_v30  ;;  %v121_v42 = vadd.f32 %v105_v19, %v85_v31  ;;  %v122_v47 = vadd.f32 %v105_v19, %v86_v37 }
  0x80   :  { %v51_v38 = vpop.permute.xlu0 %50  ;;  %v220_v12 = vpop.permute.xlu2 %219 }
  0x81   :  { %v137_v39 = vpop.permute.xlu1 %136  ;;  %v79_v51 = vmul.f32 %v698_v21, %v51_v38  ;;  %v80_v52 = vmul.f32 %v700_v22, %v51_v38  ;;  %v81_v53 = vmul.f32 %v702_v23, %v51_v38  ;;  %v82_v55 = vmul.f32 %v704_v28, %v51_v38 }
  0x82   :  { %v163_v43 = vmul.f32 %v709_v33, %v137_v39  ;;  %v164_v44 = vmul.f32 %v711_v34, %v137_v39  ;;  %v165_v45 = vmul.f32 %v713_v35, %v137_v39  ;;  %v166_v46 = vmul.f32 %v715_v36, %v137_v39 }
  0x83   :  { %v115_v57 = vadd.f32 %v100_v32, %v79_v51  ;;  %v116_v58 = vadd.f32 %v100_v32, %v80_v52  ;;  %v117_v59 = vadd.f32 %v100_v32, %v81_v53  ;;  %v118_v2 = vadd.f32 %v100_v32, %v82_v55 }
  0x84   :  { %v179_v48 = vadd.f32 %v163_v43, %v119_v40  ;;  %v180_v49 = vadd.f32 %v164_v44, %v120_v41  ;;  %v181_v50 = vadd.f32 %v165_v45, %v121_v42  ;;  %v182_v54 = vadd.f32 %v166_v46, %v122_v47 }
  0x85   :  { %v114_v41 = vadd.f32 %v95_v56, %v78_v17  ;;  %v199_v56 = vld [vmem:[%s800_s3] sm:$0xff] }
  0x86   :  { %530 = vtanh.f32 %v179_v48 }
  0x87   :  { %532 = vtanh.f32 %v180_v49 }
  0x88   :  { %534 = vtanh.f32 %v181_v50 }
  0x89   :  { %v133_v60 = vpop.permute.xlu0 %132  ;;  %536 = vtanh.f32 %v182_v54  ;;  %v204_v54 = vld [vmem:[%s801_s4 + $0x8] sm:$0xff] }
  0x8a   :  { %v159_v61 = vmul.f32 %v709_v33, %v133_v60  ;;  %v160_v62 = vmul.f32 %v711_v34, %v133_v60  ;;  %v161_v63 = vmul.f32 %v713_v35, %v133_v60  ;;  %v162_v0 = vmul.f32 %v715_v36, %v133_v60  ;;  %v41_v1 = vpop.permute.xlu1 %40  ;;  %214 = vperm.xlu0 %529, %v204_v54   ;;  %v377_v54 = vpop.permute.xlu2 %376 }
  0x8b   :  { %v71_v16 = vmul.f32 %v698_v21, %v41_v1  ;;  %v72_v18 = vmul.f32 %v700_v22, %v41_v1  ;;  %v73_v21 = vmul.f32 %v702_v23, %v41_v1  ;;  %v74_v29 = vmul.f32 %v704_v28, %v41_v1 }
  0x8c   :  { %v531_v3 = vpop.eup %530  ;;  %v175_v4 = vadd.f32 %v159_v61, %v115_v57  ;;  %v176_v5 = vadd.f32 %v160_v62, %v116_v58  ;;  %v177_v6 = vadd.f32 %v161_v63, %v117_v59  ;;  %v178_v8 = vadd.f32 %v162_v0, %v118_v2  ;;  %v200_v62 = vld [vmem:[%s800_s3 + $0x8] sm:$0xff]  ;;  %v201_v63 = vld [vmem:[%s800_s3 + $0x10] sm:$0xff]  ;;  %v202_v0 = vld [vmem:[%s800_s3 + $0x18] sm:$0xff] }
  0x8d   :  { %v533_v7 = vpop.eup %532  ;;  %252 = vmatpush.msra.mxu0 %v531_v3  ;;  %v107_v30 = vadd.f32 %v90_v26, %v71_v16  ;;  %v108_v42 = vadd.f32 %v90_v26, %v72_v18  ;;  %v109_v48 = vadd.f32 %v90_v26, %v73_v21 }
  0x8e   :  { %v535_v9 = vpop.eup %534  ;;  %281 = vmatpush.msra.mxu1 %v533_v7  ;;  %538 = vtanh.f32 %v175_v4 }
  0x8f   :  { %v537_v15 = vpop.eup %536  ;;  %310 = vmatpush.msra.mxu2 %v535_v9  ;;  %540 = vtanh.f32 %v176_v5 }
  0x90   :  { %339 = vmatpush.msra.mxu3 %v537_v15  ;;  %542 = vtanh.f32 %v177_v6 }
  0x91   :  { %v125_v19 = vpop.permute.xlu0 %124  ;;  %544 = vtanh.f32 %v178_v8 }
  0x92   :  { %v151_v27 = vmul.f32 %v709_v33, %v125_v19  ;;  %v152_v31 = vmul.f32 %v711_v34, %v125_v19  ;;  %v153_v23 = vmul.f32 %v713_v35, %v125_v19  ;;  %v154_v44 = vmul.f32 %v715_v36, %v125_v19 }
  0x93   :  { %v129_v32 = vpop.permute.xlu1 %128 }
  0x94   :  { %v539_v37 = vpop.eup %538  ;;  %v155_v14 = vmul.f32 %v709_v33, %v129_v32  ;;  %v156_v22 = vmul.f32 %v711_v34, %v129_v32  ;;  %v157_v38 = vmul.f32 %v713_v35, %v129_v32  ;;  %v158_v39 = vmul.f32 %v715_v36, %v129_v32  ;;  %v203_v34 = vld [vmem:[%s801_s4] sm:$0xff] }
  0x95   :  { %v541_v40 = vpop.eup %540  ;;  %253 = vmatpush.msra.mxu0 %v539_v37  ;;  %v167_v28 = vadd.f32 %v151_v27, %v107_v30  ;;  %209 = vperm.xlu1 %528, %v203_v34   ;;  %v110_v35 = vadd.f32 %v90_v26, %v74_v29  ;;  %v168_v50 = vadd.f32 %v152_v31, %v108_v42 }
  0x96   :  { %v543_v43 = vpop.eup %542  ;;  %282 = vmatpush.msra.mxu1 %v541_v40  ;;  %v171_v45 = vadd.f32 %v155_v14, %v111_v20  ;;  %v172_v46 = vadd.f32 %v156_v22, %v112_v24  ;;  %v173_v33 = vadd.f32 %v157_v38, %v113_v25  ;;  %v174_v49 = vadd.f32 %v158_v39, %v114_v41 }
  0x97   :  { %v545_v47 = vpop.eup %544  ;;  %311 = vmatpush.msra.mxu2 %v543_v43  ;;  %546 = vtanh.f32 %v167_v28  ;;  %v169_v36 = vadd.f32 %v153_v23, %v109_v48  ;;  %v170_v51 = vadd.f32 %v154_v44, %v110_v35 }
  0x98   :  { %340 = vmatpush.msra.mxu3 %v545_v47  ;;  %548 = vtanh.f32 %v171_v45  ;;  %v372_v45 = vld [vmem:[%s802_s5] sm:$0x1]  ;;  %s622_s5 = smov [#allocation3]  }
  0x99   :  { %550 = vtanh.f32 %v172_v46  ;;  %s487_s9 = sshll.u32 %s622_s5, 4  ;;  %s488_s9 = int_to_ptr.vmem [resolvable:$true] %s487_s9 }
  0x9a   :  { %552 = vtanh.f32 %v173_v33 }
  0x9b   :  { %554 = vtanh.f32 %v174_v49 }
  0x9c   :  { %556 = vtanh.f32 %v168_v50  ;;  %v225_v8 = vpop.permute.xlu1 %224 }
  0x9d   :  { %v547_v52 = vpop.eup %546  ;;  %558 = vtanh.f32 %v169_v36 }
  0x9e   :  { %v549_v53 = vpop.eup %548  ;;  %560 = vtanh.f32 %v170_v51 }
  0x9f   :  { %v551_v55 = vpop.eup %550  ;;  %254 = vmatpush.msra.mxu0 %v549_v53 }
  0xa0   :  { %v553_v57 = vpop.eup %552  ;;  %283 = vmatpush.msra.mxu1 %v551_v55 }
  0xa1   :  { %v555_v58 = vpop.eup %554  ;;  %312 = vmatpush.msra.mxu2 %v553_v57  ;;  %255 = vmatpush.msra.mxu0 %v547_v52 }
  0xa2   :  { %v557_v59 = vpop.eup %556  ;;  %341 = vmatpush.msra.mxu3 %v555_v58  ;;  %498 = vmatmul.msk.f32.vlgmr.msra.gmra.mxu0 %vm227_vm0, %v199_v56 }
  0xa3   :  { %v559_v60 = vpop.eup %558  ;;  %284 = vmatpush.msra.mxu1 %v557_v59 }
  0xa4   :  { %v561_v61 = vpop.eup %560  ;;  %313 = vmatpush.msra.mxu2 %v559_v60  ;;  %502 = vmatmul.msk.f32.vlgmr.msra.gmra.mxu1 %vm227_vm0, %v199_v56 }
  0xa5   :  { %342 = vmatpush.msra.mxu3 %v561_v61  ;;  %506 = vmatmul.msk.f32.vlgmr.msra.gmra.mxu2 %vm227_vm0, %v199_v56 }
  0xa6   :  { %510 = vmatmul.msk.f32.vlgmr.msra.gmra.mxu3 %vm227_vm0, %v199_v56  ;;  %v379_v56 = vperm.slane %v377_v54, 0 }
  0xaa   :  { %499 = vmatmul.msk.f32.gmra.mxu0 %vm227_vm0, %v200_v62 }
  0xac   :  { %503 = vmatmul.msk.f32.gmra.mxu1 %vm227_vm0, %v200_v62 }
  0xad   :  { %507 = vmatmul.msk.f32.gmra.mxu2 %vm227_vm0, %v200_v62 }
  0xae   :  { %511 = vmatmul.msk.f32.gmra.mxu3 %vm227_vm0, %v200_v62  ;;  %v477_v62 = vlaneseq }
  0xb0   :  { %vm479_vm4 = vcmp.lt.s32.totalorder %v477_v62, 512 }
  0xb2   :  { %500 = vmatmul.msk.f32.gmra.mxu0 %vm227_vm0, %v201_v63 }
  0xb4   :  { %504 = vmatmul.msk.f32.gmra.mxu1 %vm227_vm0, %v201_v63 }
  0xb5   :  { %508 = vmatmul.msk.f32.gmra.mxu2 %vm227_vm0, %v201_v63 }
  0xb6   :  { %512 = vmatmul.msk.f32.gmra.mxu3 %vm227_vm0, %v201_v63 }
  0xba   :  { %501 = vmatmul.msk.f32.gmra.mxu0 %vm227_vm0, %v202_v0 }
  0xbc   :  { %505 = vmatmul.msk.f32.gmra.mxu1 %vm227_vm0, %v202_v0 }
  0xbd   :  { %509 = vmatmul.msk.f32.gmra.mxu2 %vm227_vm0, %v202_v0 }
  0xbe   :  { %513 = vmatmul.msk.f32.gmra.mxu3 %vm227_vm0, %v202_v0 }
  0xfc   :  { %v215_v15 = vpop.permute.xlu0 %214 }
 0x107   :  { %v210_v26 = vpop.permute.xlu1 %209 }
 0x11f   :  { %v257_v1 = vpop.f32.mrf.mxu0 }
 0x120   :  { %v258_v21 = vadd.f32 %v257_v1, %v210_v26 }
 0x121   :  { %v286_v2 = vpop.f32.mrf.mxu1 }
 0x122   :  { %v287_v30 = vadd.f32 %v286_v2, %v210_v26 }
 0x127   :  { %v260_v3 = vpop.f32.mrf.mxu0 }
 0x128   :  { %v315_v4 = vpop.f32.mrf.mxu2  ;;  %v261_v24 = vadd.f32 %v260_v3, %v215_v15 }
 0x129   :  { %v344_v5 = vpop.f32.mrf.mxu3  ;;  %v289_v6 = vpop.f32.mrf.mxu1  ;;  %v316_v44 = vadd.f32 %v315_v4, %v210_v26 }
 0x12a   :  { %v290_v29 = vadd.f32 %v289_v6, %v215_v15  ;;  %v345_v33 = vadd.f32 %v344_v5, %v210_v26 }
 0x12f   :  { %v263_v7 = vpop.f32.mrf.mxu0 }
 0x130   :  { %v318_v9 = vpop.f32.mrf.mxu2  ;;  %v264_v16 = vadd.f32 %v263_v7, %v220_v12 }
 0x131   :  { %v347_v10 = vpop.f32.mrf.mxu3  ;;  %v292_v11 = vpop.f32.mrf.mxu1  ;;  %v319_v42 = vadd.f32 %v318_v9, %v215_v15 }
 0x132   :  { %v293_v27 = vadd.f32 %v292_v11, %v220_v12  ;;  %v348_v28 = vadd.f32 %v347_v10, %v215_v15 }
 0x137   :  { %v266_v13 = vpop.f32.mrf.mxu0 }
 0x138   :  { %v321_v17 = vpop.f32.mrf.mxu2  ;;  %v267_v18 = vadd.f32 %v266_v13, %v225_v8 }
 0x139   :  { %v350_v19 = vpop.f32.mrf.mxu3  ;;  %v295_v20 = vpop.f32.mrf.mxu1  ;;  %v322_v37 = vadd.f32 %v321_v17, %v220_v12 }
 0x13a   :  { %562 = vtanh.f32 %v267_v18  ;;  %v296_v25 = vadd.f32 %v295_v20, %v225_v8  ;;  %v351_v39 = vadd.f32 %v350_v19, %v220_v12 }
 0x13b   :  { %564 = vtanh.f32 %v264_v16 }
 0x13c   :  { %566 = vtanh.f32 %v296_v25 }
 0x13d   :  { %568 = vtanh.f32 %v261_v24 }
 0x13e   :  { %570 = vtanh.f32 %v293_v27 }
 0x13f   :  { %572 = vtanh.f32 %v258_v21 }
 0x140   :  { %v563_v31 = vpop.eup %562  ;;  %v324_v32 = vpop.f32.mrf.mxu2  ;;  %574 = vtanh.f32 %v290_v29 }
 0x141   :  { %v325_v14 = vadd.f32 %v324_v32, %v225_v8  ;;  %v353_v22 = vpop.f32.mrf.mxu3  ;;  %395 = vmatpush.msrb.mxu0 %v563_v31  ;;  %v565_v38 = vpop.eup %564  ;;  %576 = vtanh.f32 %v287_v30 }
 0x142   :  { %v354_v40 = vadd.f32 %v353_v22, %v225_v8  ;;  %v567_v41 = vpop.eup %566 }
 0x143   :  { %578 = vtanh.f32 %v325_v14  ;;  %396 = vmatpush.msrb.mxu0 %v565_v38  ;;  %v569_v23 = vpop.eup %568  ;;  %415 = vmatpush.msrb.mxu1 %v567_v41 }
 0x144   :  { %580 = vtanh.f32 %v354_v40  ;;  %v571_v43 = vpop.eup %570 }
 0x145   :  { %582 = vtanh.f32 %v322_v37  ;;  %397 = vmatpush.msrb.mxu0 %v569_v23  ;;  %v573_v46 = vpop.eup %572  ;;  %416 = vmatpush.msrb.mxu1 %v571_v43 }
 0x146   :  { %584 = vtanh.f32 %v351_v39  ;;  %v575_v34 = vpop.eup %574 }
 0x147   :  { %586 = vtanh.f32 %v319_v42  ;;  %398 = vmatpush.msrb.mxu0 %v573_v46  ;;  %v577_v47 = vpop.eup %576  ;;  %417 = vmatpush.msrb.mxu1 %v575_v34 }
 0x148   :  { %588 = vtanh.f32 %v348_v28  ;;  %514 = vmatmul.msk.f32.vlgmr.msrb.gmra.mxu0 %vm227_vm0, %v372_v45 }
 0x149   :  { %v579_v48 = vpop.eup %578  ;;  %590 = vtanh.f32 %v316_v44  ;;  %418 = vmatpush.msrb.mxu1 %v577_v47 }
 0x14a   :  { %v581_v49 = vpop.eup %580  ;;  %592 = vtanh.f32 %v345_v33  ;;  %435 = vmatpush.msrb.mxu2 %v579_v48  ;;  %515 = vmatmul.msk.f32.vlgmr.msrb.gmra.mxu1 %vm227_vm0, %v372_v45 }
 0x14b   :  { %v583_v35 = vpop.eup %582  ;;  %455 = vmatpush.msrb.mxu3 %v581_v49 }
 0x14c   :  { %v585_v50 = vpop.eup %584  ;;  %436 = vmatpush.msrb.mxu2 %v583_v35 }
 0x14d   :  { %v587_v36 = vpop.eup %586  ;;  %456 = vmatpush.msrb.mxu3 %v585_v50 }
 0x14e   :  { %v589_v51 = vpop.eup %588  ;;  %437 = vmatpush.msrb.mxu2 %v587_v36 }
 0x14f   :  { %v591_v52 = vpop.eup %590  ;;  %457 = vmatpush.msrb.mxu3 %v589_v51 }
 0x150   :  { %v593_v53 = vpop.eup %592  ;;  %438 = vmatpush.msrb.mxu2 %v591_v52 }
 0x151   :  { %458 = vmatpush.msrb.mxu3 %v593_v53  ;;  %516 = vmatmul.msk.f32.vlgmr.msrb.gmra.mxu2 %vm227_vm0, %v372_v45 }
 0x152   :  { %517 = vmatmul.msk.f32.vlgmr.msrb.gmra.mxu3 %vm227_vm0, %v372_v45 }
 0x1c5   :  { %v400_v59 = vpop.f32.mrf.mxu0 }
 0x1c6   :  { %v401_v2 = vadd.f32 %v400_v59, %v379_v56 }
 0x1c7   :  { %v420_v55 = vpop.f32.mrf.mxu1 }
 0x1c8   :  { %v421_v57 = vadd.f32 %v420_v55, %v379_v56 }
 0x1ca   :  { %v467_v63 = vrot.slane %v421_v57, 7 }
 0x1cc   :  { %v471_v4 = vsel %vm470_vm1, %v401_v2, %v467_v63 }
 0x1d4   :  { %v440_v58 = vpop.f32.mrf.mxu2 }
 0x1d5   :  { %v441_v60 = vadd.f32 %v440_v58, %v379_v56  ;;  %v460_v61 = vpop.f32.mrf.mxu3 }
 0x1d6   :  { %v461_v0 = vadd.f32 %v460_v61, %v379_v56 }
 0x1d7   :  { %v468_v1 = vrot.slane %v441_v60, 6 }
 0x1d8   :  { %v469_v3 = vrot.slane %v461_v0, 5 }
 0x1da   :  { %v473_v5 = vsel %vm472_vm2, %v468_v1, %v469_v3 }
 0x1db   :  { %v475_v6 = vsel %vm474_vm3, %v471_v4, %v473_v5 }
 0x1dc   :  { %481 = vst.msk [vmem:[#allocation3] sm:$0xf] %vm479_vm4, %v475_v6 }
 0x1dd   :  { %492 = dma.vmem_to_hbm [thread:$0]  %s488_s9, 64, %s490_s12, [#allocation4]  }
 0x1de   :  { %618 = dma.done.wait [#allocation4], 64  }
 0x1df   :  { %619 = vsyncadd [#allocation4], 4294967232 }
 0x1e0   :  { %497 = vsyncpa [#allocation4], 1 }

</bundles_post_ra>
